<compile_context>
chip_gen: v7x
topology: tpu7x:2x2x1
jax: 0.10.0
libtpu: 0.0.40
codegen_flags: <defaults>
</compile_context>

<pallas_src>
import math

import jax
import jax.numpy as jnp
from jax.experimental import pallas as pl
from jax.experimental.pallas import tpu as pltpu

# ---- synthetic "config" -----------------------------------------------------
BATCH = 2
SEQ = 8
HIDDEN = 32
NUM_HEADS = 4
HEAD_DIM = HIDDEN // NUM_HEADS
INTERMEDIATE = 64
NUM_LABELS = 2
LN_EPS = 1e-12
LANE = 128          # lane width used to pad small vectors / the logits output
NEG_INF = -1e30     # finite large-negative mask value (avoids exp(-inf) NaNs)

# packed-vector row layout (each row zero-padded to LANE lanes)
(_ROW_BQKV, _ROW_BO, _ROW_LN1G, _ROW_LN1B,
 _ROW_B1, _ROW_B2, _ROW_LN2G, _ROW_LN2B, _ROW_BC) = range(9)
N_PVEC_ROWS = 9


def _layernorm(x, gamma, beta):
    mu = jnp.mean(x, axis=-1, keepdims=True)
    var = jnp.mean(jnp.square(x - mu), axis=-1, keepdims=True)
    return (x - mu) * jax.lax.rsqrt(var + LN_EPS) * gamma + beta


def _gelu(x):
    # TODO(synk): tanh-approximate GELU; PyTorch nn.GELU default is exact erf.
    return jax.nn.gelu(x, approximate=True)


# ---- Pallas kernel ----------------------------------------------------------
def seqcls_kernel(
    x_ref,       # (B*S, H)     activations, flattened in the wrapper
    wqkv_ref,    # (H, 3H)      fused Q|K|V weight, softmax scale folded into Q
    wo_ref,      # (H, H)       attention output projection
    w1_ref,      # (H, I)       FFN up
    w2_ref,      # (I, H)       FFN down
    wc_ref,      # (H, LANE)    classifier weight, zero-padded to 128 lanes
    mask_ref,    # (B*S, B*S)   block-diagonal additive mask (0 / -1e30)
    pvec_ref,    # (9, LANE)    packed biases / LN params (one per row)
    out_ref,     # (B, LANE)    lane-dense logits (wrapper slices to NUM_LABELS)
):
    BS, H = x_ref.shape
    I = w1_ref.shape[1]
    B = BS // SEQ

    # packed bias / LN rows: static ref slices (cheap masked vlds, no full load)
    bqkv = pvec_ref[_ROW_BQKV:_ROW_BQKV + 1, 0:3 * H]
    bo = pvec_ref[_ROW_BO:_ROW_BO + 1, 0:H]
    g1 = pvec_ref[_ROW_LN1G:_ROW_LN1G + 1, 0:H]
    be1 = pvec_ref[_ROW_LN1B:_ROW_LN1B + 1, 0:H]
    b1 = pvec_ref[_ROW_B1:_ROW_B1 + 1, 0:I]
    b2 = pvec_ref[_ROW_B2:_ROW_B2 + 1, 0:H]
    g2 = pvec_ref[_ROW_LN2G:_ROW_LN2G + 1, 0:H]
    be2 = pvec_ref[_ROW_LN2B:_ROW_LN2B + 1, 0:H]
    bc = pvec_ref[_ROW_BC:_ROW_BC + 1, :]                        # (1, LANE)

    x2d = x_ref[...]                                             # (B*S, H)

    # ---- fused QKV projection over the whole batch (one matmul) ----
    qkv = jnp.dot(x2d, wqkv_ref[...], preferred_element_type=jnp.float32) + bqkv
    q = qkv[:, 0:H]            # scale already folded into wqkv / bqkv
    k = qkv[:, H:2 * H]
    v = qkv[:, 2 * H:3 * H]

    # ---- multi-head self-attention, batches fused via block-diag mask ----
    mask = mask_ref[...]                                         # (B*S, B*S)
    ctx_heads = []
    for h in range(NUM_HEADS):                                   # static loop
        c = slice(h * HEAD_DIM, (h + 1) * HEAD_DIM)
        s = jnp.dot(q[:, c], k[:, c].T,
                    preferred_element_type=jnp.float32) + mask   # (B*S, B*S)
        s = s - jnp.max(s, axis=-1, keepdims=True)
        p = jnp.exp(s)
        p = p / jnp.sum(p, axis=-1, keepdims=True)
        ctx_heads.append(jnp.dot(p, v[:, c],
                                 preferred_element_type=jnp.float32))  # (B*S, HD)
    ctx = jnp.concatenate(ctx_heads, axis=-1)                    # (B*S, H) lane concat
    attn = jnp.dot(ctx, wo_ref[...],
                   preferred_element_type=jnp.float32) + bo      # (B*S, H)

    # ---- CLS rows only from here (single-layer encoder; FFN/LN are row-wise) ----
    x_cls = jnp.concatenate([x_ref[b * SEQ:b * SEQ + 1, :] for b in range(B)],
                            axis=0)                              # (B, H)
    attn_cls = jnp.concatenate([attn[b * SEQ:b * SEQ + 1, :] for b in range(B)],
                               axis=0)                           # (B, H)
    h1 = _layernorm(x_cls + attn_cls, g1, be1)                   # (B, H)

    # ---- feed-forward on the CLS tile only ----
    f = jnp.dot(h1, w1_ref[...], preferred_element_type=jnp.float32) + b1
    f = _gelu(f)
    f = jnp.dot(f, w2_ref[...], preferred_element_type=jnp.float32) + b2
    h2 = _layernorm(h1 + f, g2, be2)                             # (B, H)

    # ---- (eval-mode) dropout = identity + classifier, lane-dense output ----
    out_ref[...] = jnp.dot(h2, wc_ref[...],
                           preferred_element_type=jnp.float32) + bc   # (B, LANE)


# ---- param packing / wrapper -------------------------------------------------
def prepare_params(params):
    (wq, bq, wk, bk, wv, bv, wo, bo,
     g1, be1, w1, b1, w2, b2, g2, be2, wc, bc) = params
    scale = 1.0 / math.sqrt(HEAD_DIM)
    wqkv = jnp.concatenate([wq * scale, wk, wv], axis=1)          # (H, 3H)
    bqkv = jnp.concatenate([bq * scale, bk, bv], axis=1)          # (1, 3H)
    wc_pad = jnp.zeros((HIDDEN, LANE), jnp.float32).at[:, :NUM_LABELS].set(wc)

    # block-diagonal (same-batch) additive attention mask, built once host-side
    bidx = jnp.arange(BATCH * SEQ) // SEQ
    mask = jnp.where(bidx[:, None] == bidx[None, :], 0.0, NEG_INF
                     ).astype(jnp.float32)                        # (B*S, B*S)

    def row(vec):
        r = jnp.zeros((1, LANE), jnp.float32)
        return r.at[:, :vec.shape[-1]].set(vec.reshape(1, -1))

    pvec = jnp.concatenate(
        [row(bqkv), row(bo), row(g1), row(be1),
         row(b1), row(b2), row(g2), row(be2), row(bc)], axis=0)   # (9, LANE)
    return wqkv, wo, w1, w2, wc_pad, mask, pvec


def sequence_classification(x, params):
    B, S, H = x.shape
    x2d = x.reshape(B * S, H)                 # wrapper-side reshape (free at HBM)
    kernel_in = (x2d,) + prepare_params(params)
    out = pl.pallas_call(
        seqcls_kernel,
        out_shape=jax.ShapeDtypeStruct((B, LANE), jnp.float32),
        # gridless single invocation: every operand is a full-array VMEM block
        in_specs=[pl.BlockSpec(memory_space=pltpu.MemorySpace.VMEM)] * len(kernel_in),
        out_specs=pl.BlockSpec(memory_space=pltpu.MemorySpace.VMEM),
    )(*kernel_in)
    return out[:, :NUM_LABELS]                                    # (B, NUM_LABELS)


# ---- pure-JAX reference (same math, unfused) ---------------------------------
def reference(x, params):
    (wq, bq, wk, bk, wv, bv, wo, bo,
     g1, be1, w1, b1, w2, b2, g2, be2, wc, bc) = params
    outs = []
    for b in range(x.shape[0]):
        xb = x[b]
        q = xb @ wq + bq
        k = xb @ wk + bk
        v = xb @ wv + bv
        heads = []
        for h in range(NUM_HEADS):
            sl = slice(h * HEAD_DIM, (h + 1) * HEAD_DIM)
            s = (q[:, sl] @ k[:, sl].T) / math.sqrt(HEAD_DIM)
            p = jax.nn.softmax(s, axis=-1)
            heads.append(p @ v[:, sl])
        attn = jnp.concatenate(heads, axis=-1) @ wo + bo
        h1 = _layernorm(xb + attn, g1, be1)
        f = _gelu(h1 @ w1 + b1) @ w2 + b2
        h2 = _layernorm(h1 + f, g2, be2)
        outs.append(h2[0:1, :] @ wc + bc)
    return jnp.concatenate(outs, axis=0)


# ---- parameter init (deterministic) ------------------------------------------
def make_params(key):
    ks = jax.random.split(key, 8)
    init = lambda k, s: 0.02 * jax.random.normal(k, s, jnp.float32)
    H, I, L = HIDDEN, INTERMEDIATE, NUM_LABELS
    wq = init(ks[0], (H, H)); bq = jnp.zeros((1, H), jnp.float32)
    wk = init(ks[1], (H, H)); bk = jnp.zeros((1, H), jnp.float32)
    wv = init(ks[2], (H, H)); bv = jnp.zeros((1, H), jnp.float32)
    wo = init(ks[3], (H, H)); bo = jnp.zeros((1, H), jnp.float32)
    g1 = jnp.ones((1, H), jnp.float32); be1 = jnp.zeros((1, H), jnp.float32)
    w1 = init(ks[4], (H, I)); b1 = jnp.zeros((1, I), jnp.float32)
    w2 = init(ks[5], (I, H)); b2 = jnp.zeros((1, H), jnp.float32)
    g2 = jnp.ones((1, H), jnp.float32); be2 = jnp.zeros((1, H), jnp.float32)
    # classifier: torch Linear(H, L) stored as (L, H); kept pre-transposed (H, L)
    wc = init(ks[6], (H, L)); bc = jnp.zeros((1, L), jnp.float32)
    return (wq, bq, wk, bk, wv, bv, wo, bo,
            g1, be1, w1, b1, w2, b2, g2, be2, wc, bc)


if __name__ == "__main__":
    key = jax.random.PRNGKey(0)
    k_param, k_x = jax.random.split(key)
    params = make_params(k_param)
    x = jax.random.normal(k_x, (BATCH, SEQ, HIDDEN), jnp.float32)

    out = sequence_classification(x, params)
    out = jax.block_until_ready(out)

    ref = reference(x, params)
    assert out.shape == (BATCH, NUM_LABELS)
    assert jnp.allclose(out, ref, atol=1e-4, rtol=1e-4), (out, ref)
    print("KERNEL_OK")
</pallas_src>

<mosaic_0001>
module attributes {stable_mosaic.version = 11 : i64} {
  func.func @seqcls_kernel(%arg0: memref<16x32xf32, #tpu.memory_space<vmem>>, %arg1: memref<32x96xf32, #tpu.memory_space<vmem>>, %arg2: memref<32x32xf32, #tpu.memory_space<vmem>>, %arg3: memref<32x64xf32, #tpu.memory_space<vmem>>, %arg4: memref<64x32xf32, #tpu.memory_space<vmem>>, %arg5: memref<32x128xf32, #tpu.memory_space<vmem>>, %arg6: memref<16x16xf32, #tpu.memory_space<vmem>>, %arg7: memref<9x128xf32, #tpu.memory_space<vmem>>, %arg8: memref<2x128xf32, #tpu.memory_space<vmem>>) attributes {dimension_semantics = [], scalar_prefetch = 0 : i64, scratch_operands = 0 : i64, tpu.core_type = #tpu.core_type<tc>} {
    %c0 = arith.constant 0 : index
    %c0_0 = arith.constant 0 : index
    %0 = vector.load %arg7[%c0, %c0_0] : memref<9x128xf32, #tpu.memory_space<vmem>>, vector<1x96xf32>
    %c1 = arith.constant 1 : index
    %c0_1 = arith.constant 0 : index
    %1 = vector.load %arg7[%c1, %c0_1] : memref<9x128xf32, #tpu.memory_space<vmem>>, vector<1x32xf32>
    %c2 = arith.constant 2 : index
    %c0_2 = arith.constant 0 : index
    %2 = vector.load %arg7[%c2, %c0_2] : memref<9x128xf32, #tpu.memory_space<vmem>>, vector<1x32xf32>
    %c3 = arith.constant 3 : index
    %c0_3 = arith.constant 0 : index
    %3 = vector.load %arg7[%c3, %c0_3] : memref<9x128xf32, #tpu.memory_space<vmem>>, vector<1x32xf32>
    %c4 = arith.constant 4 : index
    %c0_4 = arith.constant 0 : index
    %4 = vector.load %arg7[%c4, %c0_4] : memref<9x128xf32, #tpu.memory_space<vmem>>, vector<1x64xf32>
    %c5 = arith.constant 5 : index
    %c0_5 = arith.constant 0 : index
    %5 = vector.load %arg7[%c5, %c0_5] : memref<9x128xf32, #tpu.memory_space<vmem>>, vector<1x32xf32>
    %c6 = arith.constant 6 : index
    %c0_6 = arith.constant 0 : index
    %6 = vector.load %arg7[%c6, %c0_6] : memref<9x128xf32, #tpu.memory_space<vmem>>, vector<1x32xf32>
    %c7 = arith.constant 7 : index
    %c0_7 = arith.constant 0 : index
    %7 = vector.load %arg7[%c7, %c0_7] : memref<9x128xf32, #tpu.memory_space<vmem>>, vector<1x32xf32>
    %c8 = arith.constant 8 : index
    %c0_8 = arith.constant 0 : index
    %8 = vector.load %arg7[%c8, %c0_8] : memref<9x128xf32, #tpu.memory_space<vmem>>, vector<1x128xf32>
    %c0_9 = arith.constant 0 : index
    %c0_10 = arith.constant 0 : index
    %9 = vector.load %arg0[%c0_9, %c0_10] : memref<16x32xf32, #tpu.memory_space<vmem>>, vector<16x32xf32>
    %c0_11 = arith.constant 0 : index
    %c0_12 = arith.constant 0 : index
    %10 = vector.load %arg1[%c0_11, %c0_12] : memref<32x96xf32, #tpu.memory_space<vmem>>, vector<32x96xf32>
    %cst = arith.constant dense<0.000000e+00> : vector<16x96xf32>
    %11 = tpu.matmul %9, %10, %cst {dimension_numbers = #tpu.dot_dimension_numbers<[1], [0], [0], [1], [0, 0, 1, 1], [], []>} : vector<16x32xf32>, vector<32x96xf32>, vector<16x96xf32> -> vector<16x96xf32>
    %12 = vector.broadcast %0 : vector<1x96xf32> to vector<16x96xf32>
    %13 = arith.addf %11, %12 : vector<16x96xf32>
    %14 = vector.extract_strided_slice %13 {offsets = [0, 0], sizes = [16, 32], strides = [1, 1]} : vector<16x96xf32> to vector<16x32xf32>
    %15 = vector.extract_strided_slice %13 {offsets = [0, 32], sizes = [16, 32], strides = [1, 1]} : vector<16x96xf32> to vector<16x32xf32>
    %16 = vector.extract_strided_slice %13 {offsets = [0, 64], sizes = [16, 32], strides = [1, 1]} : vector<16x96xf32> to vector<16x32xf32>
    %c0_13 = arith.constant 0 : index
    %c0_14 = arith.constant 0 : index
    %17 = vector.load %arg6[%c0_13, %c0_14] : memref<16x16xf32, #tpu.memory_space<vmem>>, vector<16x16xf32>
    %18 = vector.extract_strided_slice %14 {offsets = [0, 0], sizes = [16, 8], strides = [1, 1]} : vector<16x32xf32> to vector<16x8xf32>
    %19 = vector.extract_strided_slice %15 {offsets = [0, 0], sizes = [16, 8], strides = [1, 1]} : vector<16x32xf32> to vector<16x8xf32>
    %20 = tpu.transpose %19, [1, 0] : vector<16x8xf32> -> vector<8x16xf32>
    %cst_15 = arith.constant dense<0.000000e+00> : vector<16x16xf32>
    %21 = tpu.matmul %18, %20, %cst_15 {dimension_numbers = #tpu.dot_dimension_numbers<[1], [0], [0], [1], [0, 0, 1, 1], [], []>} : vector<16x8xf32>, vector<8x16xf32>, vector<16x16xf32> -> vector<16x16xf32>
    %22 = arith.addf %21, %17 : vector<16x16xf32>
    %cst_16 = arith.constant dense<0xFF800000> : vector<16xf32>
    %23 = vector.multi_reduction <maximumf>, %22, %cst_16 [1] : vector<16x16xf32> to vector<16xf32>
    %24 = vector.shape_cast %23 : vector<16xf32> to vector<16x1xf32>
    %25 = vector.broadcast %24 : vector<16x1xf32> to vector<16x16xf32>
    %26 = arith.subf %22, %25 : vector<16x16xf32>
    %27 = math.exp %26 : vector<16x16xf32>
    %cst_17 = arith.constant dense<0.000000e+00> : vector<16xf32>
    %28 = vector.multi_reduction <add>, %27, %cst_17 [1] : vector<16x16xf32> to vector<16xf32>
    %29 = vector.shape_cast %28 : vector<16xf32> to vector<16x1xf32>
    %30 = vector.broadcast %29 : vector<16x1xf32> to vector<16x16xf32>
    %31 = arith.divf %27, %30 : vector<16x16xf32>
    %32 = vector.extract_strided_slice %16 {offsets = [0, 0], sizes = [16, 8], strides = [1, 1]} : vector<16x32xf32> to vector<16x8xf32>
    %cst_18 = arith.constant dense<0.000000e+00> : vector<16x8xf32>
    %33 = tpu.matmul %31, %32, %cst_18 {dimension_numbers = #tpu.dot_dimension_numbers<[1], [0], [0], [1], [0, 0, 1, 1], [], []>} : vector<16x16xf32>, vector<16x8xf32>, vector<16x8xf32> -> vector<16x8xf32>
    %34 = vector.extract_strided_slice %14 {offsets = [0, 8], sizes = [16, 8], strides = [1, 1]} : vector<16x32xf32> to vector<16x8xf32>
    %35 = vector.extract_strided_slice %15 {offsets = [0, 8], sizes = [16, 8], strides = [1, 1]} : vector<16x32xf32> to vector<16x8xf32>
    %36 = tpu.transpose %35, [1, 0] : vector<16x8xf32> -> vector<8x16xf32>
    %cst_19 = arith.constant dense<0.000000e+00> : vector<16x16xf32>
    %37 = tpu.matmul %34, %36, %cst_19 {dimension_numbers = #tpu.dot_dimension_numbers<[1], [0], [0], [1], [0, 0, 1, 1], [], []>} : vector<16x8xf32>, vector<8x16xf32>, vector<16x16xf32> -> vector<16x16xf32>
    %38 = arith.addf %37, %17 : vector<16x16xf32>
    %cst_20 = arith.constant dense<0xFF800000> : vector<16xf32>
    %39 = vector.multi_reduction <maximumf>, %38, %cst_20 [1] : vector<16x16xf32> to vector<16xf32>
    %40 = vector.shape_cast %39 : vector<16xf32> to vector<16x1xf32>
    %41 = vector.broadcast %40 : vector<16x1xf32> to vector<16x16xf32>
    %42 = arith.subf %38, %41 : vector<16x16xf32>
    %43 = math.exp %42 : vector<16x16xf32>
    %cst_21 = arith.constant dense<0.000000e+00> : vector<16xf32>
    %44 = vector.multi_reduction <add>, %43, %cst_21 [1] : vector<16x16xf32> to vector<16xf32>
    %45 = vector.shape_cast %44 : vector<16xf32> to vector<16x1xf32>
    %46 = vector.broadcast %45 : vector<16x1xf32> to vector<16x16xf32>
    %47 = arith.divf %43, %46 : vector<16x16xf32>
    %48 = vector.extract_strided_slice %16 {offsets = [0, 8], sizes = [16, 8], strides = [1, 1]} : vector<16x32xf32> to vector<16x8xf32>
    %cst_22 = arith.constant dense<0.000000e+00> : vector<16x8xf32>
    %49 = tpu.matmul %47, %48, %cst_22 {dimension_numbers = #tpu.dot_dimension_numbers<[1], [0], [0], [1], [0, 0, 1, 1], [], []>} : vector<16x16xf32>, vector<16x8xf32>, vector<16x8xf32> -> vector<16x8xf32>
    %50 = vector.extract_strided_slice %14 {offsets = [0, 16], sizes = [16, 8], strides = [1, 1]} : vector<16x32xf32> to vector<16x8xf32>
    %51 = vector.extract_strided_slice %15 {offsets = [0, 16], sizes = [16, 8], strides = [1, 1]} : vector<16x32xf32> to vector<16x8xf32>
    %52 = tpu.transpose %51, [1, 0] : vector<16x8xf32> -> vector<8x16xf32>
    %cst_23 = arith.constant dense<0.000000e+00> : vector<16x16xf32>
    %53 = tpu.matmul %50, %52, %cst_23 {dimension_numbers = #tpu.dot_dimension_numbers<[1], [0], [0], [1], [0, 0, 1, 1], [], []>} : vector<16x8xf32>, vector<8x16xf32>, vector<16x16xf32> -> vector<16x16xf32>
    %54 = arith.addf %53, %17 : vector<16x16xf32>
    %cst_24 = arith.constant dense<0xFF800000> : vector<16xf32>
    %55 = vector.multi_reduction <maximumf>, %54, %cst_24 [1] : vector<16x16xf32> to vector<16xf32>
    %56 = vector.shape_cast %55 : vector<16xf32> to vector<16x1xf32>
    %57 = vector.broadcast %56 : vector<16x1xf32> to vector<16x16xf32>
    %58 = arith.subf %54, %57 : vector<16x16xf32>
    %59 = math.exp %58 : vector<16x16xf32>
    %cst_25 = arith.constant dense<0.000000e+00> : vector<16xf32>
    %60 = vector.multi_reduction <add>, %59, %cst_25 [1] : vector<16x16xf32> to vector<16xf32>
    %61 = vector.shape_cast %60 : vector<16xf32> to vector<16x1xf32>
    %62 = vector.broadcast %61 : vector<16x1xf32> to vector<16x16xf32>
    %63 = arith.divf %59, %62 : vector<16x16xf32>
    %64 = vector.extract_strided_slice %16 {offsets = [0, 16], sizes = [16, 8], strides = [1, 1]} : vector<16x32xf32> to vector<16x8xf32>
    %cst_26 = arith.constant dense<0.000000e+00> : vector<16x8xf32>
    %65 = tpu.matmul %63, %64, %cst_26 {dimension_numbers = #tpu.dot_dimension_numbers<[1], [0], [0], [1], [0, 0, 1, 1], [], []>} : vector<16x16xf32>, vector<16x8xf32>, vector<16x8xf32> -> vector<16x8xf32>
    %66 = vector.extract_strided_slice %14 {offsets = [0, 24], sizes = [16, 8], strides = [1, 1]} : vector<16x32xf32> to vector<16x8xf32>
    %67 = vector.extract_strided_slice %15 {offsets = [0, 24], sizes = [16, 8], strides = [1, 1]} : vector<16x32xf32> to vector<16x8xf32>
    %68 = tpu.transpose %67, [1, 0] : vector<16x8xf32> -> vector<8x16xf32>
    %cst_27 = arith.constant dense<0.000000e+00> : vector<16x16xf32>
    %69 = tpu.matmul %66, %68, %cst_27 {dimension_numbers = #tpu.dot_dimension_numbers<[1], [0], [0], [1], [0, 0, 1, 1], [], []>} : vector<16x8xf32>, vector<8x16xf32>, vector<16x16xf32> -> vector<16x16xf32>
    %70 = arith.addf %69, %17 : vector<16x16xf32>
    %cst_28 = arith.constant dense<0xFF800000> : vector<16xf32>
    %71 = vector.multi_reduction <maximumf>, %70, %cst_28 [1] : vector<16x16xf32> to vector<16xf32>
    %72 = vector.shape_cast %71 : vector<16xf32> to vector<16x1xf32>
    %73 = vector.broadcast %72 : vector<16x1xf32> to vector<16x16xf32>
    %74 = arith.subf %70, %73 : vector<16x16xf32>
    %75 = math.exp %74 : vector<16x16xf32>
    %cst_29 = arith.constant dense<0.000000e+00> : vector<16xf32>
    %76 = vector.multi_reduction <add>, %75, %cst_29 [1] : vector<16x16xf32> to vector<16xf32>
    %77 = vector.shape_cast %76 : vector<16xf32> to vector<16x1xf32>
    %78 = vector.broadcast %77 : vector<16x1xf32> to vector<16x16xf32>
    %79 = arith.divf %75, %78 : vector<16x16xf32>
    %80 = vector.extract_strided_slice %16 {offsets = [0, 24], sizes = [16, 8], strides = [1, 1]} : vector<16x32xf32> to vector<16x8xf32>
    %cst_30 = arith.constant dense<0.000000e+00> : vector<16x8xf32>
    %81 = tpu.matmul %79, %80, %cst_30 {dimension_numbers = #tpu.dot_dimension_numbers<[1], [0], [0], [1], [0, 0, 1, 1], [], []>} : vector<16x16xf32>, vector<16x8xf32>, vector<16x8xf32> -> vector<16x8xf32>
    %82 = tpu.concatenate %33, %49, %65, %81 in 1 : vector<16x8xf32>, vector<16x8xf32>, vector<16x8xf32>, vector<16x8xf32> -> vector<16x32xf32>
    %c0_31 = arith.constant 0 : index
    %c0_32 = arith.constant 0 : index
    %83 = vector.load %arg2[%c0_31, %c0_32] : memref<32x32xf32, #tpu.memory_space<vmem>>, vector<32x32xf32>
    %cst_33 = arith.constant dense<0.000000e+00> : vector<16x32xf32>
    %84 = tpu.matmul %82, %83, %cst_33 {dimension_numbers = #tpu.dot_dimension_numbers<[1], [0], [0], [1], [0, 0, 1, 1], [], []>} : vector<16x32xf32>, vector<32x32xf32>, vector<16x32xf32> -> vector<16x32xf32>
    %85 = vector.broadcast %1 : vector<1x32xf32> to vector<16x32xf32>
    %86 = arith.addf %84, %85 : vector<16x32xf32>
    %c0_34 = arith.constant 0 : index
    %c0_35 = arith.constant 0 : index
    %87 = vector.load %arg0[%c0_34, %c0_35] : memref<16x32xf32, #tpu.memory_space<vmem>>, vector<1x32xf32>
    %c8_36 = arith.constant 8 : index
    %c0_37 = arith.constant 0 : index
    %88 = vector.load %arg0[%c8_36, %c0_37] : memref<16x32xf32, #tpu.memory_space<vmem>>, vector<1x32xf32>
    %89 = tpu.concatenate %87, %88 in 0 : vector<1x32xf32>, vector<1x32xf32> -> vector<2x32xf32>
    %90 = vector.extract_strided_slice %86 {offsets = [0, 0], sizes = [1, 32], strides = [1, 1]} : vector<16x32xf32> to vector<1x32xf32>
    %91 = vector.extract_strided_slice %86 {offsets = [8, 0], sizes = [1, 32], strides = [1, 1]} : vector<16x32xf32> to vector<1x32xf32>
    %92 = tpu.concatenate %90, %91 in 0 : vector<1x32xf32>, vector<1x32xf32> -> vector<2x32xf32>
    %93 = arith.addf %89, %92 : vector<2x32xf32>
    %cst_38 = arith.constant dense<0.000000e+00> : vector<2xf32>
    %94 = vector.multi_reduction <add>, %93, %cst_38 [1] : vector<2x32xf32> to vector<2xf32>
    %95 = vector.shape_cast %94 : vector<2xf32> to vector<2x1xf32>
    %cst_39 = arith.constant 3.200000e+01 : f32
    %96 = vector.broadcast %cst_39 : f32 to vector<2x1xf32>
    %97 = arith.divf %95, %96 : vector<2x1xf32>
    %98 = vector.broadcast %97 : vector<2x1xf32> to vector<2x32xf32>
    %99 = arith.subf %93, %98 : vector<2x32xf32>
    %100 = arith.mulf %99, %99 : vector<2x32xf32>
    %cst_40 = arith.constant dense<0.000000e+00> : vector<2xf32>
    %101 = vector.multi_reduction <add>, %100, %cst_40 [1] : vector<2x32xf32> to vector<2xf32>
    %102 = vector.shape_cast %101 : vector<2xf32> to vector<2x1xf32>
    %cst_41 = arith.constant 3.200000e+01 : f32
    %103 = vector.broadcast %cst_41 : f32 to vector<2x1xf32>
    %104 = arith.divf %102, %103 : vector<2x1xf32>
    %105 = vector.broadcast %97 : vector<2x1xf32> to vector<2x32xf32>
    %106 = arith.subf %93, %105 : vector<2x32xf32>
    %cst_42 = arith.constant 9.99999996E-13 : f32
    %107 = vector.broadcast %cst_42 : f32 to vector<2x1xf32>
    %108 = arith.addf %104, %107 : vector<2x1xf32>
    %109 = math.rsqrt %108 : vector<2x1xf32>
    %110 = vector.broadcast %109 : vector<2x1xf32> to vector<2x32xf32>
    %111 = arith.mulf %106, %110 : vector<2x32xf32>
    %112 = vector.broadcast %2 : vector<1x32xf32> to vector<2x32xf32>
    %113 = arith.mulf %111, %112 : vector<2x32xf32>
    %114 = vector.broadcast %3 : vector<1x32xf32> to vector<2x32xf32>
    %115 = arith.addf %113, %114 : vector<2x32xf32>
    %c0_43 = arith.constant 0 : index
    %c0_44 = arith.constant 0 : index
    %116 = vector.load %arg3[%c0_43, %c0_44] : memref<32x64xf32, #tpu.memory_space<vmem>>, vector<32x64xf32>
    %cst_45 = arith.constant dense<0.000000e+00> : vector<2x64xf32>
    %117 = tpu.matmul %115, %116, %cst_45 {dimension_numbers = #tpu.dot_dimension_numbers<[1], [0], [0], [1], [0, 0, 1, 1], [], []>} : vector<2x32xf32>, vector<32x64xf32>, vector<2x64xf32> -> vector<2x64xf32>
    %118 = vector.broadcast %4 : vector<1x64xf32> to vector<2x64xf32>
    %119 = arith.addf %117, %118 : vector<2x64xf32>
    %120 = arith.mulf %119, %119 : vector<2x64xf32>
    %121 = arith.mulf %119, %120 : vector<2x64xf32>
    %cst_46 = arith.constant 4.471500e-02 : f32
    %122 = vector.broadcast %cst_46 : f32 to vector<2x64xf32>
    %123 = arith.mulf %122, %121 : vector<2x64xf32>
    %124 = arith.addf %119, %123 : vector<2x64xf32>
    %cst_47 = arith.constant 0.797884583 : f32
    %125 = vector.broadcast %cst_47 : f32 to vector<2x64xf32>
    %126 = arith.mulf %125, %124 : vector<2x64xf32>
    %127 = math.tanh %126 : vector<2x64xf32>
    %cst_48 = arith.constant 1.000000e+00 : f32
    %128 = vector.broadcast %cst_48 : f32 to vector<2x64xf32>
    %129 = arith.addf %128, %127 : vector<2x64xf32>
    %cst_49 = arith.constant 5.000000e-01 : f32
    %130 = vector.broadcast %cst_49 : f32 to vector<2x64xf32>
    %131 = arith.mulf %130, %129 : vector<2x64xf32>
    %132 = arith.mulf %119, %131 : vector<2x64xf32>
    %c0_50 = arith.constant 0 : index
    %c0_51 = arith.constant 0 : index
    %133 = vector.load %arg4[%c0_50, %c0_51] : memref<64x32xf32, #tpu.memory_space<vmem>>, vector<64x32xf32>
    %cst_52 = arith.constant dense<0.000000e+00> : vector<2x32xf32>
    %134 = tpu.matmul %132, %133, %cst_52 {dimension_numbers = #tpu.dot_dimension_numbers<[1], [0], [0], [1], [0, 0, 1, 1], [], []>} : vector<2x64xf32>, vector<64x32xf32>, vector<2x32xf32> -> vector<2x32xf32>
    %135 = vector.broadcast %5 : vector<1x32xf32> to vector<2x32xf32>
    %136 = arith.addf %134, %135 : vector<2x32xf32>
    %137 = arith.addf %115, %136 : vector<2x32xf32>
    %cst_53 = arith.constant dense<0.000000e+00> : vector<2xf32>
    %138 = vector.multi_reduction <add>, %137, %cst_53 [1] : vector<2x32xf32> to vector<2xf32>
    %139 = vector.shape_cast %138 : vector<2xf32> to vector<2x1xf32>
    %cst_54 = arith.constant 3.200000e+01 : f32
    %140 = vector.broadcast %cst_54 : f32 to vector<2x1xf32>
    %141 = arith.divf %139, %140 : vector<2x1xf32>
    %142 = vector.broadcast %141 : vector<2x1xf32> to vector<2x32xf32>
    %143 = arith.subf %137, %142 : vector<2x32xf32>
    %144 = arith.mulf %143, %143 : vector<2x32xf32>
    %cst_55 = arith.constant dense<0.000000e+00> : vector<2xf32>
    %145 = vector.multi_reduction <add>, %144, %cst_55 [1] : vector<2x32xf32> to vector<2xf32>
    %146 = vector.shape_cast %145 : vector<2xf32> to vector<2x1xf32>
    %cst_56 = arith.constant 3.200000e+01 : f32
    %147 = vector.broadcast %cst_56 : f32 to vector<2x1xf32>
    %148 = arith.divf %146, %147 : vector<2x1xf32>
    %149 = vector.broadcast %141 : vector<2x1xf32> to vector<2x32xf32>
    %150 = arith.subf %137, %149 : vector<2x32xf32>
    %cst_57 = arith.constant 9.99999996E-13 : f32
    %151 = vector.broadcast %cst_57 : f32 to vector<2x1xf32>
    %152 = arith.addf %148, %151 : vector<2x1xf32>
    %153 = math.rsqrt %152 : vector<2x1xf32>
    %154 = vector.broadcast %153 : vector<2x1xf32> to vector<2x32xf32>
    %155 = arith.mulf %150, %154 : vector<2x32xf32>
    %156 = vector.broadcast %6 : vector<1x32xf32> to vector<2x32xf32>
    %157 = arith.mulf %155, %156 : vector<2x32xf32>
    %158 = vector.broadcast %7 : vector<1x32xf32> to vector<2x32xf32>
    %159 = arith.addf %157, %158 : vector<2x32xf32>
    %c0_58 = arith.constant 0 : index
    %c0_59 = arith.constant 0 : index
    %160 = vector.load %arg5[%c0_58, %c0_59] : memref<32x128xf32, #tpu.memory_space<vmem>>, vector<32x128xf32>
    %cst_60 = arith.constant dense<0.000000e+00> : vector<2x128xf32>
    %161 = tpu.matmul %159, %160, %cst_60 {dimension_numbers = #tpu.dot_dimension_numbers<[1], [0], [0], [1], [0, 0, 1, 1], [], []>} : vector<2x32xf32>, vector<32x128xf32>, vector<2x128xf32> -> vector<2x128xf32>
    %162 = vector.broadcast %8 : vector<1x128xf32> to vector<2x128xf32>
    %163 = arith.addf %161, %162 : vector<2x128xf32>
    %c0_61 = arith.constant 0 : index
    %c0_62 = arith.constant 0 : index
    %164 = vector.load %arg8[%c0_61, %c0_62] : memref<2x128xf32, #tpu.memory_space<vmem>>, vector<2x128xf32>
    tpu.vector_store %arg8[%c0_61, %c0_62], %163 {strides = array<i32>} : memref<2x128xf32, #tpu.memory_space<vmem>>, vector<2x128xf32>,
    return
  }
}

</mosaic_0001>

<bundles_post_ra>
// kernel: tpu_custom_call.1
= control target key start
LH: loop header
LB: loop body
LE: loop exit
PB: predicated region body
PF: predicated region fallthrough
CT: control target
= control target key end

     0   :  { %13 = vsyncpa [#allocation3], 0  ;;  %s2251_s0 = inlined_call_operand.hbm [shape: f32[16,32], index: 0, kind: input, shape index: {}]   ;;  %s2252_s1 = inlined_call_operand.vmem [shape: f32[32,96], index: 1, kind: input, shape index: {}]   ;;  %s2253_s2 = inlined_call_operand.vmem [shape: f32[32,32], index: 2, kind: input, shape index: {}]   ;;  %s2254_s3 = inlined_call_operand.vmem [shape: f32[32,64], index: 3, kind: input, shape index: {}]   ;;  %s2255_s4 = inlined_call_operand.vmem [shape: f32[64,32], index: 4, kind: input, shape index: {}]   ;;  %s2256_s5 = inlined_call_operand.hbm [shape: f32[32,128], index: 5, kind: input, shape index: {}]   ;;  %s2257_s6 = inlined_call_operand.vmem [shape: f32[16,16], index: 6, kind: input, shape index: {}]   ;;  %s2258_s7 = inlined_call_operand.hbm [shape: f32[9,128], index: 7, kind: input, shape index: {}]   ;;  %s2259_s8 = inlined_call_operand.hbm [shape: f32[2,128], index: 8, kind: output, shape index: {}]  }
   0x1   :  { %14 = vsyncpa [#allocation6], 0 }
   0x2   :  { %15 = vsyncpa [#allocation4], 0  ;;  %s1925_s27 = smov [#allocation5]   ;;  %s1926_s29 = smov [#allocation2]  }
   0x3   :  { %s41_s28 = sshll.u32 %s1925_s27, 4  ;;  %s21_s30 = sshll.u32 %s1926_s29, 4  ;;  %s42_s28 = int_to_ptr.vmem [resolvable:$true] %s41_s28  ;;  %s1992_s30 = int_to_ptr.vmem [resolvable:$true] %s21_s30 }
   0x4   :  { %s1831_s11 = scalar_lea.hbm %s2256_s5, 512 }
   0x5   :  { %p1832_p0 = scmp.ne.s32.totalorder %s2256_s5, %s1831_s11  ;;  %p1835_p1 = scmp.lt.u32.totalorder %s1831_s11, %s2256_s5 }
   0x7   :  { %p1837_p2 = pnand %p1835_p1, %p1832_p0 }
   0x9   :  { %1840 = shalt.err (!%p1837_p2)
}
   0xa   :  { %s1841_s16 = scalar_lea.vmem %s42_s28, 512  ;;  %p1846_p4 = scmp.lt.s32.totalorder %s42_s28, %s42_s28 }
   0xb   :  { %p1842_p3 = scmp.ne.s32.totalorder %s42_s28, %s1841_s16  ;;  %p1847_p5 = scmp.lt.s32.totalorder %s1841_s16, %s1841_s16 }
   0xd   :  { %p1848_p6 = por %p1847_p5, %p1846_p4 }
   0xf   :  { %p1849_p7 = pnand %p1848_p6, %p1842_p3 }
  0x11   :  { %1852 = shalt.err (!%p1849_p7)
}
  0x12   :  { %s1927_s17 = smov 128   ;;  %s1928_s18 = smov 8  }
  0x13   :  { %47 = dma.hbm_to_vmem [thread:$0]  %s2256_s5, 512, %s42_s28, [#allocation6], %s1927_s17, %s1927_s17, %s1928_s18  }
  0x14   :  { %s1853_s23 = scalar_lea.hbm %s2251_s0, 256 }
  0x15   :  { %p1854_p8 = scmp.ne.s32.totalorder %s2251_s0, %s1853_s23  ;;  %p1857_p9 = scmp.lt.u32.totalorder %s1853_s23, %s2251_s0 }
  0x17   :  { %p1859_p10 = pnand %p1857_p9, %p1854_p8 }
  0x19   :  { %1862 = shalt.err (!%p1859_p10)
}
  0x1a   :  { %s1863_s29 = scalar_lea.vmem %s1992_s30, 256  ;;  %p1868_p12 = scmp.lt.s32.totalorder %s1992_s30, %s1992_s30 }
  0x1b   :  { %p1864_p11 = scmp.ne.s32.totalorder %s1992_s30, %s1863_s29  ;;  %p1869_p13 = scmp.lt.s32.totalorder %s1863_s29, %s1863_s29 }
  0x1d   :  { %p1870_p0 = por %p1869_p13, %p1868_p12 }
  0x1f   :  { %p1871_p1 = pnand %p1870_p0, %p1864_p11 }
  0x21   :  { %1874 = shalt.err (!%p1871_p1)
}
  0x22   :  { %27 = dma.hbm_to_vmem [thread:$0]  %s2251_s0, 256, %s1992_s30, [#allocation3], %s1927_s17, %s1927_s17, %s1928_s18  }
  0x23   :  { %s1929_s9 = smov [#allocation7]   ;;  %s1875_s13 = scalar_lea.hbm %s2258_s7, 256 }
  0x24   :  { %s55_s10 = sshll.u32 %s1929_s9, 4  ;;  %p1876_p2 = scmp.ne.s32.totalorder %s2258_s7, %s1875_s13  ;;  %s56_s10 = int_to_ptr.vmem [resolvable:$true] %s55_s10 }
  0x25   :  { %p1879_p3 = scmp.lt.u32.totalorder %s1875_s13, %s2258_s7 }
  0x27   :  { %p1881_p4 = pnand %p1879_p3, %p1876_p2 }
  0x29   :  { %1884 = shalt.err (!%p1881_p4)
}
  0x2a   :  { %s1885_s20 = scalar_lea.vmem %s56_s10, 256  ;;  %p1890_p6 = scmp.lt.s32.totalorder %s56_s10, %s56_s10 }
  0x2b   :  { %p1886_p5 = scmp.ne.s32.totalorder %s56_s10, %s1885_s20  ;;  %p1891_p7 = scmp.lt.s32.totalorder %s1885_s20, %s1885_s20 }
  0x2d   :  { %p1892_p8 = por %p1891_p7, %p1890_p6 }
  0x2f   :  { %p1893_p9 = pnand %p1892_p8, %p1886_p5 }
  0x31   :  { %1896 = shalt.err (!%p1893_p9)
}
  0x32   :  { %61 = dma.hbm_to_vmem [thread:$0]  %s2258_s7, 256, %s56_s10, [#allocation6], %s1927_s17, %s1927_s17, %s1928_s18  }
  0x33   :  { %1919 = dma.done.wait [#allocation3], 256  }
  0x34   :  { %1920 = vsyncadd [#allocation3], 4294967040 }
  0x35   :  { %1921 = dma.done.wait [#allocation6], 768  }
  0x36   :  { %1922 = vsyncadd [#allocation6], 4294966528  ;;  %vm90_vm0 = vcmask 261120   ;;  %v82_v0 = vld [vmem:[%s2252_s1] sm:$0xff]  ;;  %v83_v1 = vld [vmem:[%s2252_s1 + $0x8] sm:$0xff]  ;;  %vm180_vm1 = vcmask 64512  }
  0x37   :  { %v84_v2 = vld [vmem:[%s2252_s1 + $0x10] sm:$0xff]  ;;  %v1651_v3 = vpack.c.bf16 %v83_v1, %v82_v0  ;;  %v85_v4 = vld [vmem:[%s2252_s1 + $0x18] sm:$0xff]  ;;  %v80_v5 = vld [vmem:[#allocation2] sm:$0xff]  ;;  %s1930_s1 = smov 96   ;;  %vm264_vm3 = vcmask 130048   ;;  %s1931_s9 = smov 64  }
  0x38   :  { %v1655_v6 = vpack.c.bf16 %v85_v4, %v84_v2  ;;  %1540 = vmatprep.mubr.msk.f32.mxu0 %vm90_vm0, %v80_v5  ;;  %v81_v7 = vld [vmem:[#allocation2 + $0x8] sm:$0xff]  ;;  %v1429_v8 = vld [vmem:[#allocation7] ss:$0 sm:$0xff]  ;;  %vm2071_vm2 = vmpackc.low %vm180_vm1, %vm180_vm1  ;;  %s1932_s10 = smov 88   ;;  %s1934_s11 = smov 56   ;;  %vm1002_vm4 = vcmask 195584  }
  0x39   :  { %1652 = vmatprep.subr.bf16.mxu0 %v1651_v3  ;;  %v2084_v19 = vld [vmem:[%s2257_s6 + $0x8] sm:$0xff]  ;;  %v2089_v20 = vld [vmem:[%s2257_s6] sm:$0xff]  ;;  %s1933_s6 = smov 120   ;;  %s1935_s12 = smov 80   ;;  %vm1099_vm5 = vcmask 1040384   ;;  %vm1106_vm6 = vcmask 254976  }
  0x3a   :  { %1654 = vmatpush3.bf16.msra.mxu0 %v1651_v3  ;;  %s1936_s13 = smov 112   ;;  %s1937_s14 = smov 72   ;;  %vm1944_vm7 = vmmov 0   ;;  %vm1233_vm8 = vcmask 523264  }
  0x3b   :  { %1656 = vmatprep.subr.bf16.mxu0 %v1655_v6  ;;  %s1938_s15 = smov 104   ;;  %s1939_s16 = smov 48  }
  0x3c   :  { %s1940_s19 = smov 40   ;;  %s1941_s20 = smov 16  }
  0x3d   :  { %s1942_s26 = smov 24  }
  0x3e   :  { %1658 = vmatpush3.bf16.msra.mxu0 %v1655_v6 }
  0x41   :  { %1541 = vmatmul.mubr.msk.f32.vlgmr.msra.gmra.mrb[0].mxu0 %vm90_vm0, %v81_v7 }
 0x114   :  { %v1542_v9 = vpop.f32.mrb[0].mxu0 }
 0x115   :  { %v2058_v10 = vadd.f32 %v1542_v9, %v1429_v8  ;;  %v163_v11 = vpop.f32.mrb[1].mxu0 }
 0x116   :  { %v2060_v12 = vadd.f32 %v1429_v8, %v163_v11 }
 0x118   :  { %1547 = vmatprep.mubr.msk.f32.mxu1 %vm180_vm1, %v2060_v12  ;;  %v2066_v13 = vpack.i.bf16 %v2058_v10, %v2060_v12 }
 0x11a   :  { %1754 = vrot.lane.b32.xlu0 %v2066_v13, %s1930_s1 }
 0x18c   :  { %v1755_v14 = vpop.permute.xlu0 %1754 }
 0x18d   :  { %v1757_v15 = vunpack.i.h.bf16 %v1755_v14  ;;  %v1756_v16 = vunpack.i.l.bf16 %v1755_v14 }
 0x18f   :  { %v1659_v18 = vpack.c.bf16 %v1757_v15, %v1756_v16 }
 0x191   :  { %1661 = vmatprep.subr.msk.bf16.mxu1 %vm2071_vm2, %v1659_v18 }
 0x192   :  { %1664 = vmatpush3.bf16.xpose.msk.msra.mxu1 %vm2071_vm2, %v1659_v18 }
 0x199   :  { %1548 = vmatmul.mubr.msk.f32.vlgmr.msra.gmra.mrb[0].mxu1 %vm180_vm1, %v2058_v10 }
 0x26c   :  { %v1549_v21 = vpop.f32.mrb[0].mxu1 }
 0x26d   :  { %v261_v22 = vadd.f32 %v1549_v21, %v2084_v19  ;;  %v255_v23 = vpop.f32.mrb[1].mxu1 }
 0x26e   :  { %v256_v24 = vadd.f32 %v255_v23, %v2089_v20 }
 0x26f   :  { %v268_v25 = vsel %vm264_vm3, %v261_v22, -inf }
 0x270   :  { %269 = vmax.xlane.f32.xlu1 %v268_v25  ;;  %v265_v26 = vsel %vm264_vm3, %v256_v24, -inf }
 0x271   :  { %266 = vmax.xlane.f32.xlu0 %v265_v26 }
 0x281   :  { %1759 = vrot.lane.b32.xlu1 %v2066_v13, %s1931_s9 }
 0x285   :  { %1764 = vrot.lane.b32.xlu1 %v2066_v13, %s1932_s10 }
 0x287   :  { %376 = vrot.lane.b32.xlu0 %v2058_v10, %s1933_s6 }
 0x2fd   :  { %v270_v27 = vpop.xlane.xlu1 %269 }
 0x2fe   :  { %v272_v28 = vsub.f32 %v261_v22, %v270_v27  ;;  %v267_v29 = vpop.xlane.xlu0 %266 }
 0x2ff   :  { %v271_v30 = vsub.f32 %v256_v24, %v267_v29 }
 0x300   :  { %v275_v31 = vmul.f32 1.442695, %v272_v28 }
 0x301   :  { %v273_v32 = vmul.f32 1.442695, %v271_v30  ;;  %v1760_v33 = vpop.permute.xlu1 %1759 }
 0x302   :  { %1793 = vpow2.f32 %v275_v31  ;;  %v1762_v34 = vunpack.i.h.bf16 %v1760_v33  ;;  %v1761_v35 = vunpack.i.l.bf16 %v1760_v33  ;;  %v377_v52 = vpop.permute.xlu0 %376 }
 0x303   :  { %1795 = vpow2.f32 %v273_v32 }
 0x304   :  { %v1665_v36 = vpack.c.bf16 %v1762_v34, %v1761_v35 }
 0x305   :  { %v1765_v37 = vpop.permute.xlu1 %1764 }
 0x306   :  { %v1767_v38 = vunpack.i.h.bf16 %v1765_v37  ;;  %v1766_v39 = vunpack.i.l.bf16 %v1765_v37  ;;  %1666 = vmatprep.subr.bf16.mxu1 %v1665_v36 }
 0x307   :  { %1668 = vmatpush3.bf16.msra.mxu1 %v1665_v36 }
 0x308   :  { %v1669_v40 = vpack.c.bf16 %v1767_v38, %v1766_v39 }
 0x30a   :  { %1671 = vmatprep.subr.msk.bf16.mxu1 %vm2071_vm2, %v1669_v40 }
 0x30c   :  { %v1794_v41 = vpop.eup %1793 }
 0x30d   :  { %v280_v42 = vsel %vm264_vm3, %v1794_v41, 0.0  ;;  %v1796_v43 = vpop.eup %1795 }
 0x30e   :  { %281 = vadd.xlane.f32.xlu1 %v280_v42  ;;  %v277_v44 = vsel %vm264_vm3, %v1796_v43, 0.0 }
 0x312   :  { %278 = vadd.xlane.f32.xlu1 %v277_v44 }
 0x323   :  { %374 = vrot.lane.b32.xlu1 %v2060_v12, %s1933_s6 }
 0x39b   :  { %v282_v45 = vpop.xlane.xlu1 %281 }
 0x39c   :  { %1797 = vrcp.f32 %v282_v45 }
 0x39f   :  { %v279_v46 = vpop.xlane.xlu1 %278 }
 0x3a0   :  { %1799 = vrcp.f32 %v279_v46 }
 0x3a3   :  { %v375_v51 = vpop.permute.xlu1 %374 }
 0x3a6   :  { %v1798_v47 = vpop.eup %1797 }
 0x3a7   :  { %v286_v50 = vmul.f32 %v1798_v47, %v1794_v41 }
 0x3aa   :  { %v1800_v48 = vpop.eup %1799 }
 0x3ab   :  { %v284_v49 = vmul.f32 %v1800_v48, %v1796_v43 }
 0x3ad   :  { %1554 = vmatprep.mubr.msk.f32.mxu1 %vm264_vm3, %v284_v49 }
 0x3ae   :  { %1555 = vmatmul.mubr.msk.f32.vlgmr.msra.gmra.mrb[2].mxu1 %vm264_vm3, %v286_v50 }
 0x3af   :  { %1674 = vmatpush3.bf16.xpose.msk.msra.mxu1 %vm2071_vm2, %v1669_v40  ;;  %1561 = vmatprep.mubr.msk.f32.mxu1 %vm180_vm1, %v375_v51 }
 0x3b6   :  { %1562 = vmatmul.mubr.msk.f32.vlgmr.msra.gmra.mrb[4].mxu1 %vm180_vm1, %v377_v52 }
 0x481   :  { %v2109_v53 = vpop.f32.mrb[2].mxu1 }
 0x482   :  { %v2111_v54 = vpop.f32.mrb[3].mxu1 }
 0x489   :  { %v1563_v55 = vpop.f32.mrb[4].mxu1 }
 0x48a   :  { %v462_v56 = vadd.f32 %v1563_v55, %v2084_v19  ;;  %v456_v57 = vpop.f32.mrb[5].mxu1 }
 0x48b   :  { %v457_v58 = vadd.f32 %v456_v57, %v2089_v20 }
 0x48c   :  { %v468_v59 = vsel %vm264_vm3, %v462_v56, -inf }
 0x48d   :  { %469 = vmax.xlane.f32.xlu0 %v468_v59  ;;  %v465_v60 = vsel %vm264_vm3, %v457_v58, -inf }
 0x48e   :  { %466 = vmax.xlane.f32.xlu1 %v465_v60 }
 0x49f   :  { %1769 = vrot.lane.b32.xlu1 %v2066_v13, %s1934_s11 }
 0x4a3   :  { %1774 = vrot.lane.b32.xlu0 %v2066_v13, %s1935_s12  ;;  %574 = vrot.lane.b32.xlu1 %v2060_v12, %s1936_s13 }
 0x51a   :  { %v470_v61 = vpop.xlane.xlu0 %469 }
 0x51b   :  { %v472_v62 = vsub.f32 %v462_v56, %v470_v61  ;;  %v467_v63 = vpop.xlane.xlu1 %466 }
 0x51c   :  { %v471_v0 = vsub.f32 %v457_v58, %v467_v63 }
 0x51d   :  { %v475_v1 = vmul.f32 1.442695, %v472_v62 }
 0x51e   :  { %v473_v2 = vmul.f32 1.442695, %v471_v0  ;;  %v1775_v3 = vpop.permute.xlu0 %1774 }
 0x51f   :  { %1801 = vpow2.f32 %v475_v1  ;;  %v1770_v4 = vpop.permute.xlu1 %1769  ;;  %v1777_v5 = vunpack.i.h.bf16 %v1775_v3  ;;  %v1776_v6 = vunpack.i.l.bf16 %v1775_v3 }
 0x520   :  { %v1772_v7 = vunpack.i.h.bf16 %v1770_v4  ;;  %v1771_v8 = vunpack.i.l.bf16 %v1770_v4  ;;  %1803 = vpow2.f32 %v473_v2 }
 0x521   :  { %v1679_v11 = vpack.c.bf16 %v1777_v5, %v1776_v6 }
 0x522   :  { %v1675_v9 = vpack.c.bf16 %v1772_v7, %v1771_v8 }
 0x523   :  { %v575_v21 = vpop.permute.xlu1 %574 }
 0x524   :  { %1676 = vmatprep.subr.bf16.mxu0 %v1675_v9 }
 0x525   :  { %1678 = vmatpush3.bf16.msra.mxu0 %v1675_v9 }
 0x526   :  { %1681 = vmatprep.subr.msk.bf16.mxu0 %vm2071_vm2, %v1679_v11 }
 0x529   :  { %v1802_v14 = vpop.eup %1801 }
 0x52a   :  { %v480_v15 = vsel %vm264_vm3, %v1802_v14, 0.0  ;;  %v1804_v16 = vpop.eup %1803 }
 0x52b   :  { %481 = vadd.xlane.f32.xlu1 %v480_v15  ;;  %v477_v18 = vsel %vm264_vm3, %v1804_v16, 0.0 }
 0x52f   :  { %478 = vadd.xlane.f32.xlu1 %v477_v18 }
 0x540   :  { %576 = vrot.lane.b32.xlu1 %v2058_v10, %s1936_s13 }
 0x5b8   :  { %v482_v22 = vpop.xlane.xlu1 %481 }
 0x5b9   :  { %1805 = vrcp.f32 %v482_v22 }
 0x5bc   :  { %v479_v23 = vpop.xlane.xlu1 %478 }
 0x5bd   :  { %1807 = vrcp.f32 %v479_v23 }
 0x5c0   :  { %v577_v28 = vpop.permute.xlu1 %576 }
 0x5c3   :  { %v1806_v24 = vpop.eup %1805 }
 0x5c4   :  { %v486_v27 = vmul.f32 %v1806_v24, %v1802_v14 }
 0x5c7   :  { %v1808_v25 = vpop.eup %1807 }
 0x5c8   :  { %v484_v26 = vmul.f32 %v1808_v25, %v1804_v16 }
 0x5ca   :  { %1568 = vmatprep.mubr.msk.f32.mxu0 %vm264_vm3, %v484_v26 }
 0x5cb   :  { %1569 = vmatmul.mubr.msk.f32.vlgmr.msra.gmra.mrb[2].mxu0 %vm264_vm3, %v486_v27 }
 0x5cc   :  { %1684 = vmatpush3.bf16.xpose.msk.msra.mxu0 %vm2071_vm2, %v1679_v11  ;;  %1575 = vmatprep.mubr.msk.f32.mxu0 %vm180_vm1, %v575_v21 }
 0x5d3   :  { %1576 = vmatmul.mubr.msk.f32.vlgmr.msra.gmra.mrb[4].mxu0 %vm180_vm1, %v577_v28 }
 0x69e   :  { %v2131_v29 = vpop.f32.mrb[2].mxu0 }
 0x69f   :  { %v2133_v30 = vpop.f32.mrb[3].mxu0 }
 0x6a6   :  { %v1577_v31 = vpop.f32.mrb[4].mxu0 }
 0x6a7   :  { %v662_v32 = vadd.f32 %v1577_v31, %v2084_v19  ;;  %v656_v33 = vpop.f32.mrb[5].mxu0  ;;  %v1007_v31 = vld [vmem:[%s2253_s2 + $0x10] sm:$0xff] }
 0x6a8   :  { %v657_v34 = vadd.f32 %v656_v33, %v2089_v20  ;;  %v1008_v33 = vld [vmem:[%s2253_s2 + $0x18] sm:$0xff] }
 0x6a9   :  { %v668_v35 = vsel %vm264_vm3, %v662_v32, -inf }
 0x6aa   :  { %669 = vmax.xlane.f32.xlu0 %v668_v35  ;;  %v665_v36 = vsel %vm264_vm3, %v657_v34, -inf }
 0x6ab   :  { %666 = vmax.xlane.f32.xlu1 %v665_v36 }
 0x737   :  { %v670_v37 = vpop.xlane.xlu0 %669 }
 0x738   :  { %v672_v38 = vsub.f32 %v662_v32, %v670_v37  ;;  %v667_v39 = vpop.xlane.xlu1 %666 }
 0x739   :  { %v671_v40 = vsub.f32 %v657_v34, %v667_v39  ;;  %v1703_v34 = vpack.c.bf16 %v1008_v33, %v1007_v31 }
 0x73a   :  { %v675_v41 = vmul.f32 1.442695, %v672_v38 }
 0x73b   :  { %v673_v42 = vmul.f32 1.442695, %v671_v40 }
 0x73c   :  { %1809 = vpow2.f32 %v675_v41 }
 0x73d   :  { %1811 = vpow2.f32 %v673_v42 }
 0x746   :  { %v1810_v43 = vpop.eup %1809 }
 0x747   :  { %v1812_v44 = vpop.eup %1811  ;;  %v680_v45 = vsel %vm264_vm3, %v1810_v43, 0.0 }
 0x748   :  { %681 = vadd.xlane.f32.xlu1 %v680_v45  ;;  %v677_v46 = vsel %vm264_vm3, %v1812_v44, 0.0 }
 0x749   :  { %678 = vadd.xlane.f32.xlu0 %v677_v46 }
 0x759   :  { %1784 = vrot.lane.b32.xlu1 %v2066_v13, %s1937_s14 }
 0x75d   :  { %774 = vrot.lane.b32.xlu1 %v2060_v12, %s1938_s15 }
 0x75f   :  { %1779 = vrot.lane.b32.xlu0 %v2066_v13, %s1939_s16 }
 0x763   :  { %776 = vrot.lane.b32.xlu0 %v2058_v10, %s1938_s15 }
 0x7d5   :  { %v682_v47 = vpop.xlane.xlu1 %681 }
 0x7d6   :  { %1813 = vrcp.f32 %v682_v47  ;;  %v679_v48 = vpop.xlane.xlu0 %678 }
 0x7d7   :  { %1815 = vrcp.f32 %v679_v48 }
 0x7d9   :  { %v1785_v49 = vpop.permute.xlu1 %1784 }
 0x7da   :  { %v1780_v50 = vpop.permute.xlu0 %1779  ;;  %v1787_v51 = vunpack.i.h.bf16 %v1785_v49  ;;  %v1786_v52 = vunpack.i.l.bf16 %v1785_v49  ;;  %v1095_v49 = vld [vmem:[#allocation2 + $0x8] sm:$0x1] }
 0x7db   :  { %v1782_v55 = vunpack.i.h.bf16 %v1780_v50  ;;  %v1781_v56 = vunpack.i.l.bf16 %v1780_v50  ;;  %v1456_v50 = vld [vmem:[#allocation7 + $0x1] ss:$0 sm:$0xff] }
 0x7dc   :  { %v1689_v58 = vpack.c.bf16 %v1787_v51, %v1786_v52  ;;  %v1097_v51 = vrot.slane %v1095_v49, 7 }
 0x7dd   :  { %v1685_v57 = vpack.c.bf16 %v1782_v55, %v1781_v56  ;;  %v775_v61 = vpop.permute.xlu1 %774 }
 0x7de   :  { %v777_v62 = vpop.permute.xlu0 %776 }
 0x7df   :  { %1686 = vmatprep.subr.bf16.mxu1 %v1685_v57 }
 0x7e0   :  { %v1814_v59 = vpop.eup %1813  ;;  %1688 = vmatpush3.bf16.msra.mxu1 %v1685_v57 }
 0x7e1   :  { %v1816_v12 = vpop.eup %1815  ;;  %1691 = vmatprep.subr.msk.bf16.mxu1 %vm2071_vm2, %v1689_v58  ;;  %v686_v60 = vmul.f32 %v1814_v59, %v1810_v43 }
 0x7e2   :  { %v684_v10 = vmul.f32 %v1816_v12, %v1812_v44 }
 0x7e4   :  { %1582 = vmatprep.mubr.msk.f32.mxu1 %vm264_vm3, %v684_v10 }
 0x7e5   :  { %1583 = vmatmul.mubr.msk.f32.vlgmr.msra.gmra.mrb[6].mxu1 %vm264_vm3, %v686_v60 }
 0x7e6   :  { %1589 = vmatprep.mubr.msk.f32.mxu1 %vm180_vm1, %v775_v61 }
 0x7e9   :  { %1694 = vmatpush3.bf16.xpose.msk.msra.mxu1 %vm2071_vm2, %v1689_v58 }
 0x7f0   :  { %1590 = vmatmul.mubr.msk.f32.vlgmr.msra.gmra.mrb[8].mxu1 %vm180_vm1, %v777_v62 }
 0x8b8   :  { %v1584_v63 = vpop.f32.mrb[6].mxu1 }
 0x8b9   :  { %v765_v0 = vpop.f32.mrb[7].mxu1 }
 0x8c3   :  { %v1591_v1 = vpop.f32.mrb[8].mxu1 }
 0x8c4   :  { %v862_v2 = vadd.f32 %v1591_v1, %v2084_v19  ;;  %v856_v3 = vpop.f32.mrb[9].mxu1  ;;  %v1131_v1 = vld [vmem:[%s2254_s3] sm:$0xff] }
 0x8c5   :  { %v857_v4 = vadd.f32 %v856_v3, %v2089_v20 }
 0x8c6   :  { %v868_v5 = vsel %vm264_vm3, %v862_v2, -inf }
 0x8c7   :  { %869 = vmax.xlane.f32.xlu0 %v868_v5  ;;  %v865_v6 = vsel %vm264_vm3, %v857_v4, -inf  ;;  %v1133_v5 = vld [vmem:[%s2254_s3 + $0x10] sm:$0xff] }
 0x8c8   :  { %866 = vmax.xlane.f32.xlu1 %v865_v6  ;;  %v1134_v6 = vld [vmem:[%s2254_s3 + $0x18] sm:$0xff] }
 0x954   :  { %v870_v7 = vpop.xlane.xlu0 %869 }
 0x955   :  { %v872_v17 = vsub.f32 %v862_v2, %v870_v7  ;;  %v867_v8 = vpop.xlane.xlu1 %866  ;;  %v1132_v2 = vld [vmem:[%s2254_s3 + $0x8] sm:$0xff]  ;;  %v1711_v7 = vpack.c.bf16 %v1134_v6, %v1133_v5  ;;  %v1467_v6 = vld [vmem:[#allocation7 + $0x8] ss:$0 sm:$0xff] }
 0x956   :  { %v871_v9 = vsub.f32 %v857_v4, %v867_v8  ;;  %v1708_v3 = vpack.c.bf16 %v1132_v2, %v1131_v1  ;;  %v1943_v4 = vmov 0.0|0.0   ;;  %v1466_v2 = vld [vmem:[#allocation7 + $0x7] ss:$0 sm:$0xff] }
 0x957   :  { %v875_v11 = vmul.f32 1.442695, %v872_v17  ;;  %1707 = vmatprep.subr.bf16.mxu1 %v1943_v4  ;;  %v1945_v17 = vmov 0.0  }
 0x958   :  { %v873_v14 = vmul.f32 1.442695, %v871_v9  ;;  %1709 = vmatpush3.bf16.msra.mxu1 %v1708_v3  ;;  %1618 = vmatprep.mubr.msk.f32.mxu1 %vm1944_vm7, %v1945_v17 }
 0x959   :  { %1817 = vpow2.f32 %v875_v11  ;;  %1710 = vmatprep.subr.bf16.mxu1 %v1943_v4 }
 0x95a   :  { %1819 = vpow2.f32 %v873_v14 }
 0x95c   :  { %1712 = vmatpush3.bf16.msra.mxu1 %v1711_v7 }
 0x95d   :  { %1725 = vmatprep.subr.bf16.mxu1 %v1943_v4 }
 0x963   :  { %v1818_v15 = vpop.eup %1817 }
 0x964   :  { %v1820_v16 = vpop.eup %1819  ;;  %v880_v19 = vsel %vm264_vm3, %v1818_v15, 0.0 }
 0x965   :  { %881 = vadd.xlane.f32.xlu1 %v880_v19  ;;  %v877_v20 = vsel %vm264_vm3, %v1820_v16, 0.0  ;;  %v1460_v19 = vld [vmem:[#allocation7 + $0x3] ss:$0 sm:$0xff] }
 0x966   :  { %878 = vadd.xlane.f32.xlu0 %v877_v20 }
 0x976   :  { %976 = vrot.lane.b32.xlu1 %v2133_v30, %s1928_s18  ;;  %v1006_v30 = vld [vmem:[%s2253_s2 + $0x8] sm:$0xff] }
 0x97a   :  { %978 = vrot.lane.b32.xlu1 %v2131_v29, %s1928_s18 }
 0x97c   :  { %1789 = vrot.lane.b32.xlu0 %v2066_v13, %s1940_s19  ;;  %v1005_v13 = vld [vmem:[%s2253_s2] sm:$0xff] }
 0x97d   :  { %v1699_v32 = vpack.c.bf16 %v1006_v30, %v1005_v13  ;;  %v1227_v13 = vld [vmem:[%s2255_s4 + $0x30] sm:$0xff]  ;;  %v1228_v30 = vld [vmem:[%s2255_s4 + $0x38] sm:$0xff] }
 0x97e   :  { %986 = vrot.lane.b32.xlu1 %v1584_v63, %s1941_s20  ;;  %v1723_v31 = vpack.c.bf16 %v1228_v30, %v1227_v13 }
 0x980   :  { %984 = vrot.lane.b32.xlu0 %v765_v0, %s1941_s20 }
 0x9f2   :  { %v882_v18 = vpop.xlane.xlu1 %881 }
 0x9f3   :  { %1821 = vrcp.f32 %v882_v18  ;;  %v879_v21 = vpop.xlane.xlu0 %878 }
 0x9f4   :  { %1823 = vrcp.f32 %v879_v21  ;;  %v1221_v21 = vld [vmem:[%s2255_s4] sm:$0xff] }
 0x9f6   :  { %v977_v37 = vpop.permute.xlu1 %976 }
 0x9f7   :  { %v1790_v22 = vpop.permute.xlu0 %1789  ;;  %v998_v41 = vsel %vm180_vm1, %v2111_v54, %v977_v37  ;;  %v1094_v54 = vld [vmem:[#allocation2] sm:$0x1] }
 0x9f8   :  { %v1792_v23 = vunpack.i.h.bf16 %v1790_v22  ;;  %v1791_v24 = vunpack.i.l.bf16 %v1790_v22  ;;  %v1100_v58 = vsel %vm1099_vm5, %v1094_v54, %v1097_v51  ;;  %v1222_v22 = vld [vmem:[%s2255_s4 + $0x8] sm:$0xff] }
 0x9fa   :  { %v1695_v25 = vpack.c.bf16 %v1792_v23, %v1791_v24  ;;  %v979_v38 = vpop.permute.xlu1 %978  ;;  %v1714_v23 = vpack.c.bf16 %v1222_v22, %v1221_v21  ;;  %v1223_v24 = vld [vmem:[%s2255_s4 + $0x10] sm:$0xff] }
 0x9fb   :  { %v985_v40 = vpop.permute.xlu0 %984  ;;  %v999_v43 = vsel %vm180_vm1, %v2109_v53, %v979_v38 }
 0x9fc   :  { %1696 = vmatprep.subr.bf16.mxu0 %v1695_v25  ;;  %v1000_v44 = vsel %vm264_vm3, %v998_v41, %v985_v40 }
 0x9fd   :  { %v1822_v26 = vpop.eup %1821  ;;  %1698 = vmatpush3.bf16.msra.mxu0 %v1695_v25  ;;  %v1224_v25 = vld [vmem:[%s2255_s4 + $0x18] sm:$0xff] }
 0x9fe   :  { %v1824_v27 = vpop.eup %1823  ;;  %v886_v29 = vmul.f32 %v1822_v26, %v1818_v15  ;;  %1700 = vmatprep.subr.bf16.mxu0 %v1699_v32  ;;  %v987_v39 = vpop.permute.xlu1 %986  ;;  %v1459_v15 = vld [vmem:[#allocation7 + $0x2] ss:$0 sm:$0xff]  ;;  %v1717_v26 = vpack.c.bf16 %v1224_v25, %v1223_v24 }
 0x9ff   :  { %v884_v28 = vmul.f32 %v1824_v27, %v1820_v16  ;;  %v1001_v46 = vsel %vm264_vm3, %v999_v43, %v987_v39  ;;  %v1225_v27 = vld [vmem:[%s2255_s4 + $0x20] sm:$0xff] }
 0xa01   :  { %1596 = vmatprep.mubr.msk.f32.mxu0 %vm264_vm3, %v884_v28  ;;  %v1226_v28 = vld [vmem:[%s2255_s4 + $0x28] sm:$0xff]  ;;  %s1946_s4 = smov [#allocation8]  }
 0xa02   :  { %1597 = vmatmul.mubr.msk.f32.vlgmr.msra.gmra.mrb[6].mxu0 %vm264_vm3, %v886_v29  ;;  %v1720_v29 = vpack.c.bf16 %v1226_v28, %v1225_v27  ;;  %s1419_s22 = sshll.u32 %s1946_s4, 4  ;;  %s1420_s22 = int_to_ptr.vmem [resolvable:$true] %s1419_s22 }
 0xa03   :  { %1702 = vmatpush3.bf16.msra.mxu0 %v1699_v32  ;;  %v1461_v32 = vld [vmem:[#allocation7 + $0x4] ss:$0 sm:$0xff]  ;;  %s1897_s23 = scalar_lea.vmem %s1420_s22, 32  ;;  %p1902_p11 = scmp.lt.s32.totalorder %s1420_s22, %s1420_s22 }
 0xa04   :  { %1704 = vmatprep.subr.bf16.mxu0 %v1703_v34  ;;  %p1898_p10 = scmp.ne.s32.totalorder %s1420_s22, %s1897_s23  ;;  %p1903_p12 = scmp.lt.s32.totalorder %s1897_s23, %s1897_s23 }
 0xa06   :  { %p1904_p13 = por %p1903_p12, %p1902_p11 }
 0xa07   :  { %1706 = vmatpush3.bf16.msra.mxu0 %v1703_v34 }
 0xa08   :  { %1713 = vmatprep.subr.bf16.mxu0 %v1943_v4  ;;  %p1905_p0 = pnand %p1904_p13, %p1898_p10 }
 0xad5   :  { %v1598_v35 = vpop.f32.mrb[6].mxu0 }
 0xad6   :  { %994 = vrot.lane.b32.xlu1 %v1598_v35, %s1942_s26  ;;  %v965_v36 = vpop.f32.mrb[7].mxu0 }
 0xad7   :  { %992 = vrot.lane.b32.xlu0 %v965_v36, %s1942_s26 }
 0xb48   :  { %v995_v42 = vpop.permute.xlu1 %994 }
 0xb49   :  { %v993_v45 = vpop.permute.xlu0 %992  ;;  %v1004_v48 = vsel %vm1002_vm4, %v1001_v46, %v995_v42 }
 0xb4a   :  { %v1003_v47 = vsel %vm1002_vm4, %v1000_v44, %v993_v45  ;;  %v1463_v45 = vld [vmem:[#allocation7 + $0x5] ss:$0 sm:$0xff] }
 0xb4b   :  { %1607 = vmatprep.mubr.msk.f32.mxu0 %vm90_vm0, %v1003_v47 }
 0xb4c   :  { %1608 = vmatmul.mubr.msk.f32.vlgmr.msra.gmra.mrb[8].mxu0 %vm90_vm0, %v1004_v48 }
 0xb4d   :  { %1637 = vmatprep.mubr.msk.f32.mxu0 %vm1944_vm7, %v1945_v17  ;;  %1715 = vmatpush3.bf16.msra.mxu0 %v1714_v23 }
 0xb4e   :  { %1716 = vmatprep.subr.bf16.mxu0 %v1943_v4 }
 0xb51   :  { %1718 = vmatpush3.bf16.msra.mxu0 %v1717_v26 }
 0xb52   :  { %1719 = vmatprep.subr.bf16.mxu0 %v1943_v4 }
 0xb55   :  { %1721 = vmatpush3.bf16.msra.mxu0 %v1720_v29 }
 0xb56   :  { %1722 = vmatprep.subr.bf16.mxu0 %v1943_v4 }
 0xb59   :  { %1724 = vmatpush3.bf16.msra.mxu0 %v1723_v31 }
 0xc1f   :  { %v1609_v52 = vpop.f32.mrb[8].mxu0 }
 0xc20   :  { %v1091_v55 = vadd.f32 %v1609_v52, %v1456_v50  ;;  %v1085_v56 = vpop.f32.mrb[9].mxu0 }
 0xc21   :  { %v1086_v53 = vadd.f32 %v1456_v50, %v1085_v56 }
 0xc22   :  { %v1102_v57 = vrot.slane %v1091_v55, 7 }
 0xc24   :  { %v1104_v59 = vsel %vm1099_vm5, %v1086_v53, %v1102_v57  ;;  %v1331_v53 = vld [vmem:[#allocation5] sm:$0xff]  ;;  %v1332_v57 = vld [vmem:[#allocation5 + $0x8] sm:$0xff] }
 0xc25   :  { %v1105_v12 = vadd.f32 %v1104_v59, %v1100_v58  ;;  %v1726_v58 = vpack.c.bf16 %v1332_v57, %v1331_v53  ;;  %v1333_v59 = vld [vmem:[#allocation5 + $0x10] sm:$0xff] }
 0xc27   :  { %v1107_v10 = vsel %vm1106_vm6, %v1105_v12, 0.0 }
 0xc28   :  { %1108 = vadd.xlane.f32.xlu0 %v1107_v10 }
 0xcb5   :  { %v1109_v60 = vpop.xlane.xlu0 %1108 }
 0xcb6   :  { %v1111_v61 = vmul.f32 0.03125, %v1109_v60 }
 0xcb8   :  { %v1112_v62 = vsub.f32 %v1105_v12, %v1111_v61  ;;  %v1334_v12 = vld [vmem:[#allocation5 + $0x18] sm:$0xff] }
 0xcb9   :  { %v1729_v10 = vpack.c.bf16 %v1334_v12, %v1333_v59 }
 0xcba   :  { %v1113_v63 = vmul.f32 %v1112_v62, %v1112_v62 }
 0xcbc   :  { %v1114_v0 = vsel %vm1106_vm6, %v1113_v63, 0.0 }
 0xcbd   :  { %1115 = vadd.xlane.f32.xlu1 %v1114_v0  ;;  %v1465_v0 = vld [vmem:[#allocation7 + $0x6] ss:$0 sm:$0xff] }
 0xd4a   :  { %v1116_v8 = vpop.xlane.xlu1 %1115 }
 0xd4b   :  { %v1117_v9 = vmul.f32 0.03125, %v1116_v8 }
 0xd4d   :  { %v1118_v11 = vadd.f32 1e-12, %v1117_v9 }
 0xd4f   :  { %1825 = vrsqrt.f32 %v1118_v11 }
 0xd59   :  { %v1826_v14 = vpop.eup %1825 }
 0xd5a   :  { %v1120_v16 = vmul.f32 %v1826_v14, %v1112_v62 }
 0xd5c   :  { %v1125_v20 = vmul.f32 %v1459_v15, %v1120_v16 }
 0xd5e   :  { %v1130_v18 = vadd.f32 %v1460_v19, %v1125_v20 }
 0xd60   :  { %1619 = vmatmul.mubr.msk.f32.vlgmr.msra.gmra.mrb[10].mxu1 %vm90_vm0, %v1130_v18 }
 0xd61   :  { %1648 = vmatprep.mubr.msk.f32.mxu1 %vm1944_vm7, %v1945_v17  ;;  %1727 = vmatpush3.bf16.msra.mxu1 %v1726_v58 }
 0xd62   :  { %1728 = vmatprep.subr.bf16.mxu1 %v1943_v4 }
 0xd65   :  { %1730 = vmatpush3.bf16.msra.mxu1 %v1729_v10 }
 0xe33   :  { %v1208_v33 = vpop.f32.mrb[10].mxu1 }
 0xe34   :  { %v1209_v34 = vadd.f32 %v1461_v32, %v1208_v33  ;;  %v1620_v35 = vpop.f32.mrb[11].mxu1 }
 0xe36   :  { %v1212_v36 = vmul.f32 %v1209_v34, %v1209_v34 }
 0xe38   :  { %v1213_v37 = vmul.f32 %v1212_v36, %v1209_v34 }
 0xe3a   :  { %v1214_v38 = vmul.f32 0.044715, %v1213_v37 }
 0xe3c   :  { %v1215_v39 = vadd.f32 %v1214_v38, %v1209_v34 }
 0xe3e   :  { %v1216_v40 = vmul.f32 0.7978846, %v1215_v39 }
 0xe40   :  { %1827 = vtanh.f32 %v1216_v40 }
 0xe4a   :  { %v1828_v41 = vpop.eup %1827 }
 0xe4b   :  { %v1218_v42 = vadd.f32 1.0, %v1828_v41 }
 0xe4d   :  { %v1219_v43 = vmul.f32 0.5, %v1218_v42 }
 0xe4f   :  { %v1220_v44 = vmul.f32 %v1219_v43, %v1209_v34 }
 0xe51   :  { %1638 = vmatmul.mubr.msk.f32.vlgmr.msra.gmra.mrb[10].mxu0 %vm1233_vm8, %v1220_v44 }
 0xf24   :  { %v1303_v46 = vpop.f32.mrb[10].mxu0 }
 0xf25   :  { %v1304_v47 = vadd.f32 %v1463_v45, %v1303_v46  ;;  %v1639_v48 = vpop.f32.mrb[11].mxu0 }
 0xf27   :  { %v1307_v49 = vadd.f32 %v1304_v47, %v1130_v18 }
 0xf29   :  { %v1308_v50 = vsel %vm1106_vm6, %v1307_v49, 0.0 }
 0xf2a   :  { %1309 = vadd.xlane.f32.xlu0 %v1308_v50 }
 0xfb7   :  { %v1310_v51 = vpop.xlane.xlu0 %1309 }
 0xfb8   :  { %v1311_v52 = vmul.f32 0.03125, %v1310_v51 }
 0xfba   :  { %v1312_v54 = vsub.f32 %v1307_v49, %v1311_v52 }
 0xfbc   :  { %v1313_v55 = vmul.f32 %v1312_v54, %v1312_v54 }
 0xfbe   :  { %v1314_v56 = vsel %vm1106_vm6, %v1313_v55, 0.0 }
 0xfbf   :  { %1315 = vadd.xlane.f32.xlu0 %v1314_v56 }
0x104c   :  { %v1316_v60 = vpop.xlane.xlu0 %1315 }
0x104d   :  { %v1317_v61 = vmul.f32 0.03125, %v1316_v60 }
0x104f   :  { %v1318_v62 = vadd.f32 1e-12, %v1317_v61 }
0x1051   :  { %1829 = vrsqrt.f32 %v1318_v62 }
0x105b   :  { %v1830_v63 = vpop.eup %1829 }
0x105c   :  { %v1320_v1 = vmul.f32 %v1830_v63, %v1312_v54 }
0x105e   :  { %v1325_v3 = vmul.f32 %v1465_v0, %v1320_v1 }
0x1060   :  { %v1330_v5 = vadd.f32 %v1466_v2, %v1325_v3 }
0x1062   :  { %1649 = vmatmul.mubr.msk.f32.vlgmr.msra.gmra.mrb[12].mxu1 %vm90_vm0, %v1330_v5 }
0x1135   :  { %v1408_v4 = vpop.f32.mrb[12].mxu1 }
0x1136   :  { %v1409_v7 = vadd.f32 %v1467_v6, %v1408_v4  ;;  %v1650_v17 = vpop.f32.mrb[13].mxu1 }
0x1138   :  { %1412 = vst [vmem:[#allocation8] sm:$0x3] %v1409_v7 }
0x1139   :  { %1908 = shalt.err (!%p1905_p0)
}
0x113a   :  { %s1909_s26 = scalar_lea.hbm %s2259_s8, 32 }
0x113b   :  { %p1910_p1 = scmp.ne.s32.totalorder %s2259_s8, %s1909_s26  ;;  %p1913_p2 = scmp.lt.u32.totalorder %s1909_s26, %s2259_s8 }
0x113d   :  { %p1915_p3 = pnand %p1913_p2, %p1910_p1 }
0x113f   :  { %1918 = shalt.err (!%p1915_p3)
}
0x1140   :  { %1422 = dma.vmem_to_hbm [thread:$0]  %s1420_s22, 32, %s2259_s8, [#allocation4]  }
0x1141   :  { %1923 = dma.done.wait [#allocation4], 32  }
0x1142   :  { %1924 = vsyncadd [#allocation4], 4294967264 }
0x1143   :  { %1426 = vsyncpa [#allocation3], 1 }
0x1144   :  { %1427 = vsyncpa [#allocation6], 1 }
0x1145   :  { %1428 = vsyncpa [#allocation4], 1 }

</bundles_post_ra>
